<compile_context>
chip_gen: v6e
topology: v6e:2x2x1
jax: 0.10.0
libtpu: 0.0.40
codegen_flags: <defaults>
</compile_context>

<pallas_src>
import jax
import jax.numpy as jnp
from jax.experimental import pallas as pl
from jax.experimental.pallas import tpu as pltpu


def _round_up(x, m):
    return (x + m - 1) // m * m


def _patch_embed_kernel(x_ref, w_ref, b_ref, o_ref):
    # x_ref: (tm, Kp) bf16, w_ref: (Kp, tn) bf16, b_ref: (1, tn) f32,
    # o_ref: (tm, tn).  MXU matmul with f32 accumulation, bias add in f32.
    acc = jnp.dot(x_ref[...], w_ref[...], preferred_element_type=jnp.float32)
    o_ref[...] = (acc + b_ref[...]).astype(o_ref.dtype)


# VMEM working-set budget / scoped limit chosen to be safe on v7x (64 MiB
# physical VMEM) while well above the 32 MiB scoped default.
_VMEM_BUDGET = 40 * 1024 * 1024
_VMEM_LIMIT = 48 * 1024 * 1024


def _vmem_need(tm, tn, k, in_bytes, out_bytes):
    """Conservative per-step VMEM estimate (double-buffered blocks + f32 acc)."""
    x_b = 2 * tm * k * in_bytes          # activation block (double-buffered)
    w_b = 2 * k * tn * in_bytes          # weight block
    b_b = 2 * 8 * tn * 4                 # bias block (padded to 8 sublanes)
    o_b = 2 * tm * tn * out_bytes        # output block (double-buffered)
    acc = tm * tn * 4                    # f32 matmul result before cast/store
    return x_b + w_b + b_b + o_b + acc


def patch_embed(x, weight, bias, patch_size, *, tm=1024, tn=None,
                compute_dtype=jnp.bfloat16, out_dtype=None):
    """ViT patch embedding.

    x: (B, C, H, W) NCHW; weight: (E, C, P, P) OIHW; bias: (E,).
    Returns (B, N, E) with N = (H // P) * (W // P).
    out_dtype defaults to x.dtype (matches the PyTorch module); pass
    compute_dtype (bf16) to halve output writeback traffic.
    """
    B, C, H, W = x.shape
    E = weight.shape[0]
    P = patch_size
    Hp, Wp = H // P, W // P
    N = Hp * Wp
    K = C * P * P
    M = B * N
    out_dtype = x.dtype if out_dtype is None else jnp.dtype(out_dtype)
    in_bytes = jnp.dtype(compute_dtype).itemsize
    out_bytes = jnp.dtype(out_dtype).itemsize

    # A stride-P conv floors: drop trailing rows/cols not covered by a patch.
    x = x[:, :, :Hp * P, :Wp * P]

    # im2col: (B, C, Hp, P, Wp, P) -> (B, Hp, Wp, C, P, P) -> (M, K), each
    # patch flattened in (c, ph, pw) order to match the OIHW weight layout.
    # The bf16 cast fuses into the transpose copy -> single materialization.
    # TODO(synk): fold this rearrangement into the kernel (BlockSpec over
    # (B, Hp) of the NCHW input + in-kernel swizzle) to remove the remaining
    # HBM round-trip of the im2col buffer.
    x_patches = (
        x.reshape(B, C, Hp, P, Wp, P)
         .transpose(0, 2, 4, 1, 3, 5)
         .reshape(M, K)
         .astype(compute_dtype)
    )
    w_mat = weight.reshape(E, K).T.astype(compute_dtype)   # (K, E)
    b_mat = bias.reshape(1, E).astype(jnp.float32)         # (1, E)

    # ---- tile selection ----------------------------------------------------
    Kp = _round_up(K, 128)
    Ep = _round_up(E, 128)

    # tm: multiple of 128 (full MXU passes), no larger than padded M; keep at
    # least 2 M tiles when M allows so the parallel M axis can be sharded
    # across v7x's two TensorCores.
    tm_eff = max(128, _round_up(min(tm, _round_up(M, 128)), 128))
    if M > 128:
        tm_eff = min(tm_eff, max(128, _round_up(pl.cdiv(M, 2), 128)))

    # tn: prefer collapsing the E axis (single HBM pass over activations).
    tn_eff = Ep if tn is None else min(_round_up(tn, 128), Ep)

    def fits(m, n):
        return _vmem_need(m, n, Kp, in_bytes, out_bytes) <= _VMEM_BUDGET

    # Shrink tm first (keeps the single-pass layout); only for very large E
    # fall back to tiling E, with M as the outer (resident) grid axis.
    while not fits(tm_eff, tn_eff) and tm_eff > 256:
        tm_eff -= 128
    if not fits(tm_eff, tn_eff):
        for cand in (1024, 512, 256, 128):
            if cand >= tn_eff:
                continue
            tn_eff = cand
            if fits(tm_eff, tn_eff):
                break
        while not fits(tm_eff, tn_eff) and tm_eff > 128:
            tm_eff -= 128

    Mp = _round_up(M, tm_eff)
    Epad = _round_up(Ep, tn_eff)

    # ---- padding (only when actually needed) -------------------------------
    if (Mp, Kp) != (M, K):
        x_patches = jnp.pad(x_patches, ((0, Mp - M), (0, Kp - K)))
    w_p = w_mat if (Kp, Epad) == (K, E) else jnp.pad(
        w_mat, ((0, Kp - K), (0, Epad - E)))
    b_p = b_mat if Epad == E else jnp.pad(b_mat, ((0, 0), (0, Epad - E)))

    n_mtiles = Mp // tm_eff
    n_etiles = Epad // tn_eff

    if n_etiles == 1:
        # Single pass: weight/bias and the full output row-block stay
        # VMEM-resident; 1-D parallel grid over M tiles.
        grid = (n_mtiles,)
        in_specs = [
            pl.BlockSpec((tm_eff, Kp), lambda i: (i, 0)),     # activations
            pl.BlockSpec((Kp, tn_eff), lambda i: (0, 0)),     # weight (resident)
            pl.BlockSpec((1, tn_eff), lambda i: (0, 0)),      # bias   (resident)
        ]
        out_specs = pl.BlockSpec((tm_eff, tn_eff), lambda i: (i, 0))
        dims = ("parallel",)
        w_reads = 1
    else:
        # Large-E fallback: M outer -> activations resident across the inner E
        # sweep (streamed from HBM once); the small weight is re-streamed.
        grid = (n_mtiles, n_etiles)
        in_specs = [
            pl.BlockSpec((tm_eff, Kp), lambda i, j: (i, 0)),
            pl.BlockSpec((Kp, tn_eff), lambda i, j: (0, j)),
            pl.BlockSpec((1, tn_eff), lambda i, j: (0, j)),
        ]
        out_specs = pl.BlockSpec((tm_eff, tn_eff), lambda i, j: (i, j))
        dims = ("parallel", "arbitrary")
        w_reads = n_mtiles

    bytes_accessed = (Mp * Kp * in_bytes                 # activations: 1 pass
                      + Kp * Epad * in_bytes * w_reads   # weight
                      + Epad * 4 * w_reads               # bias
                      + Mp * Epad * out_bytes)           # output writeback
    cost = pl.CostEstimate(flops=2 * Mp * Kp * Epad, transcendentals=0,
                           bytes_accessed=int(bytes_accessed))

    out = pl.pallas_call(
        _patch_embed_kernel,
        out_shape=jax.ShapeDtypeStruct((Mp, Epad), out_dtype),
        grid=grid,
        in_specs=in_specs,
        out_specs=out_specs,
        compiler_params=pltpu.CompilerParams(
            dimension_semantics=dims,
            vmem_limit_bytes=_VMEM_LIMIT,
        ),
        cost_estimate=cost,
    )(x_patches, w_p, b_p)

    return out[:M, :E].reshape(B, N, E)


def reference_patch_embed(x, weight, bias, patch_size, precision=None):
    """Pure-JAX reference using lax.conv (matches the PyTorch forward)."""
    y = jax.lax.conv_general_dilated(
        x, weight,
        window_strides=(patch_size, patch_size),
        padding="VALID",
        dimension_numbers=("NCHW", "OIHW", "NCHW"),
        precision=precision,
    ) + bias.reshape(1, -1, 1, 1)
    B, E, Hp, Wp = y.shape
    return y.reshape(B, E, Hp * Wp).transpose(0, 2, 1)


if __name__ == "__main__":
    # Small shapes consistent with the module: img_size=16, patch=4, C=4, E=32
    B, C, H, W = 2, 4, 16, 16
    P, E = 4, 32

    keys = jax.random.split(jax.random.PRNGKey(0), 6)
    x = jax.random.normal(keys[0], (B, C, H, W), dtype=jnp.float32)
    # Deterministic synthetic parameters (Conv2d shapes: (E, C, P, P) and (E,))
    weight = jax.random.normal(keys[1], (E, C, P, P), dtype=jnp.float32) * 0.02
    bias = jax.random.normal(keys[2], (E,), dtype=jnp.float32) * 0.02

    out = jax.block_until_ready(patch_embed(x, weight, bias, P))
    assert out.shape == (B, (H // P) * (W // P), E), out.shape

    hp = jax.lax.Precision.HIGHEST
    # Tight check: same bf16 input rounding as the kernel, true-f32 accumulation.
    ref_bf16 = reference_patch_embed(
        x.astype(jnp.bfloat16).astype(jnp.float32),
        weight.astype(jnp.bfloat16).astype(jnp.float32),
        bias, P, precision=hp)
    assert jnp.allclose(out, ref_bf16, atol=1e-3, rtol=1e-3), \
        f"max abs err (bf16 ref): {float(jnp.max(jnp.abs(out - ref_bf16)))}"

    # Loose check against the full-f32 reference (catches semantic errors).
    ref_f32 = reference_patch_embed(x, weight, bias, P, precision=hp)
    assert jnp.allclose(out, ref_f32, atol=3e-2, rtol=3e-2), \
        f"max abs err (f32 ref): {float(jnp.max(jnp.abs(out - ref_f32)))}"

    # Second tiny case exercising the K/E padding path (K=147, E=20).
    B2, C2, H2, W2, P2, E2 = 1, 3, 14, 14, 7, 20
    x2 = jax.random.normal(keys[3], (B2, C2, H2, W2), dtype=jnp.float32)
    w2 = jax.random.normal(keys[4], (E2, C2, P2, P2), dtype=jnp.float32) * 0.02
    b2 = jax.random.normal(keys[5], (E2,), dtype=jnp.float32) * 0.02
    out2 = jax.block_until_ready(patch_embed(x2, w2, b2, P2))
    assert out2.shape == (B2, (H2 // P2) * (W2 // P2), E2), out2.shape
    ref2 = reference_patch_embed(
        x2.astype(jnp.bfloat16).astype(jnp.float32),
        w2.astype(jnp.bfloat16).astype(jnp.float32),
        b2, P2, precision=hp)
    assert jnp.allclose(out2, ref2, atol=1e-3, rtol=1e-3), \
        f"max abs err (case 2): {float(jnp.max(jnp.abs(out2 - ref2)))}"

    print("KERNEL_OK")
</pallas_src>

<mosaic_0001>
module attributes {stable_mosaic.version = 11 : i64} {
  func.func @_patch_embed_kernel(%arg0: i32, %arg1: memref<128x128xbf16, #tpu.memory_space<vmem>>, %arg2: memref<128x128xbf16, #tpu.memory_space<vmem>>, %arg3: memref<1x128xf32, #tpu.memory_space<vmem>>, %arg4: memref<128x128xf32, #tpu.memory_space<vmem>>) attributes {dimension_semantics = [#tpu.dimension_semantics<parallel>], iteration_bounds = array<i64: 1>, scalar_prefetch = 0 : i64, scratch_operands = 0 : i64, tpu.core_type = #tpu.core_type<tc>, window_params = [{transform_indices = @transform_0, window_bounds = array<i64: 128, 128>}, {pipeline_mode = #tpu.pipeline_mode<synchronous>, transform_indices = @transform_1, window_bounds = array<i64: 128, 128>}, {pipeline_mode = #tpu.pipeline_mode<synchronous>, transform_indices = @transform_2, window_bounds = array<i64: 1, 128>}, {transform_indices = @transform_3, window_bounds = array<i64: 128, 128>}]} {
    %c0 = arith.constant 0 : index
    %c0_0 = arith.constant 0 : index
    %0 = vector.load %arg1[%c0, %c0_0] : memref<128x128xbf16, #tpu.memory_space<vmem>>, vector<128x128xbf16>
    %c0_1 = arith.constant 0 : index
    %c0_2 = arith.constant 0 : index
    %1 = vector.load %arg2[%c0_1, %c0_2] : memref<128x128xbf16, #tpu.memory_space<vmem>>, vector<128x128xbf16>
    %cst = arith.constant dense<0.000000e+00> : vector<128x128xf32>
    %2 = tpu.matmul %0, %1, %cst {dimension_numbers = #tpu.dot_dimension_numbers<[1], [0], [0], [1], [0, 0, 1, 1], [], []>} : vector<128x128xbf16>, vector<128x128xbf16>, vector<128x128xf32> -> vector<128x128xf32>
    %c0_3 = arith.constant 0 : index
    %c0_4 = arith.constant 0 : index
    %3 = vector.load %arg3[%c0_3, %c0_4] : memref<1x128xf32, #tpu.memory_space<vmem>>, vector<1x128xf32>
    %4 = vector.broadcast %3 : vector<1x128xf32> to vector<128x128xf32>
    %5 = arith.addf %2, %4 : vector<128x128xf32>
    %c0_5 = arith.constant 0 : index
    %c0_6 = arith.constant 0 : index
    %6 = vector.load %arg4[%c0_5, %c0_6] : memref<128x128xf32, #tpu.memory_space<vmem>>, vector<128x128xf32>
    tpu.vector_store %arg4[%c0_5, %c0_6], %5 {strides = array<i32>} : memref<128x128xf32, #tpu.memory_space<vmem>>, vector<128x128xf32>,
    return
  }
  func.func @transform_0(%arg0: i32) -> (i32, i32) {
    %c0_i32 = arith.constant 0 : i32
    %c0_i32_0 = arith.constant 0 : i32
    return %arg0, %c0_i32 : i32, i32
  }
  func.func @transform_1(%arg0: i32) -> (i32, i32) {
    %c0_i32 = arith.constant 0 : i32
    %c0_i32_0 = arith.constant 0 : i32
    %c0_i32_1 = arith.constant 0 : i32
    return %c0_i32, %c0_i32_0 : i32, i32
  }
  func.func @transform_2(%arg0: i32) -> (i32, i32) {
    %c0_i32 = arith.constant 0 : i32
    %c0_i32_0 = arith.constant 0 : i32
    %c0_i32_1 = arith.constant 0 : i32
    return %c0_i32, %c0_i32_0 : i32, i32
  }
  func.func @transform_3(%arg0: i32) -> (i32, i32) {
    %c0_i32 = arith.constant 0 : i32
    %c0_i32_0 = arith.constant 0 : i32
    return %arg0, %c0_i32 : i32, i32
  }
}

</mosaic_0001>

<bundles_post_ra>
// kernel: tpu_custom_call.1
= control target key start
LH: loop header
LB: loop body
LE: loop exit
PB: predicated region body
PF: predicated region fallthrough
CT: control target
= control target key end

     0   :  { %8 = vsyncpa [#allocation3], 0  ;;  %s519_s0 = inlined_call_operand.hbm [shape: bf16[128,128], index: 0, kind: input, shape index: {}]   ;;  %s520_s1 = inlined_call_operand.hbm [shape: bf16[128,128], index: 1, kind: input, shape index: {}]   ;;  %s521_s2 = inlined_call_operand.vmem [shape: f32[1,128], index: 2, kind: input, shape index: {}]   ;;  %s522_s3 = inlined_call_operand.hbm [shape: f32[128,128], index: 3, kind: output, shape index: {}]  }
   0x1   :  { %9 = vsyncpa [#allocation6], 0 }
   0x2   :  { %10 = vsyncpa [#allocation4], 0  ;;  %s480_s12 = smov [#allocation2]  }
   0x3   :  { %s16_s13 = sshll.u32 %s480_s12, 4  ;;  %s17_s13 = int_to_ptr.vmem [resolvable:$true] %s16_s13 }
   0x4   :  { %s422_s14 = scalar_lea.vmem %s17_s13, 1024  ;;  %p427_p1 = scmp.lt.s32.totalorder %s17_s13, %s17_s13 }
   0x5   :  { %p423_p0 = scmp.ne.s32.totalorder %s17_s13, %s422_s14  ;;  %p428_p2 = scmp.lt.s32.totalorder %s422_s14, %s422_s14 }
   0x7   :  { %p429_p3 = por %p428_p2, %p427_p1 }
   0x9   :  { %p430_p4 = pnand %p429_p3, %p423_p0 }
   0xb   :  { %433 = shalt.err (!%p430_p4)
}
   0xc   :  { %s481_s15 = smov 64   ;;  %s482_s16 = smov 4  }
   0xd   :  { %22 = dma.hbm_to_vmem [thread:$0]  %s519_s0, 1024, %s17_s13, [#allocation3], %s481_s15, %s481_s15, %s482_s16  }
   0xe   :  { %s483_s19 = smov [#allocation5]  }
   0xf   :  { %s28_s20 = sshll.u32 %s483_s19, 4  ;;  %s29_s20 = int_to_ptr.vmem [resolvable:$true] %s28_s20 }
  0x10   :  { %s442_s21 = scalar_lea.vmem %s29_s20, 1024  ;;  %p447_p6 = scmp.lt.s32.totalorder %s29_s20, %s29_s20 }
  0x11   :  { %p443_p5 = scmp.ne.s32.totalorder %s29_s20, %s442_s21  ;;  %p448_p7 = scmp.lt.s32.totalorder %s442_s21, %s442_s21 }
  0x13   :  { %p449_p8 = por %p448_p7, %p447_p6 }
  0x15   :  { %p450_p9 = pnand %p449_p8, %p443_p5 }
  0x17   :  { %453 = shalt.err (!%p450_p9)
}
  0x18   :  { %34 = dma.hbm_to_vmem [thread:$0]  %s520_s1, 1024, %s29_s20, [#allocation6], %s481_s15, %s481_s15, %s482_s16  }
  0x19   :  { %474 = dma.done.wait [#allocation3], 1024  }
  0x1a   :  { %475 = vsyncadd [#allocation3], 4294966272 }
  0x1b   :  { %476 = dma.done.wait [#allocation6], 1024  }
  0x1c   :  { %477 = vsyncadd [#allocation6], 4294966272  ;;  %v398_v0 = vld [vmem:[#allocation5 + $0x38] sm:$0xff]   ;;  %v399_v1 = vld [vmem:[#allocation5 + $0x30] sm:$0xff]  }
  0x1d   :  { %343 = vmatprep.subr.bf16.mxu0 %v398_v0  ;;  %375 = vmatprep.subr.bf16.mxu1 %v398_v0  ;;  %v400_v2 = vld [vmem:[#allocation5 + $0x28] sm:$0xff]   ;;  %v401_v3 = vld [vmem:[#allocation5 + $0x20] sm:$0xff]   ;;  %v402_v6 = vld [vmem:[#allocation5 + $0x18] sm:$0xff]  }
  0x1e   :  { %344 = vmatpush3.bf16.msra.mxu0 %v398_v0  ;;  %383 = vmatpush3.bf16.msra.mxu1 %v398_v0  ;;  %v406_v4 = vld [vmem:[#allocation2] sm:$0xff]   ;;  %v403_v7 = vld [vmem:[#allocation5 + $0x10] sm:$0xff]   ;;  %v404_v8 = vld [vmem:[#allocation5 + $0x8] sm:$0xff]  }
  0x1f   :  { %345 = vmatprep.subr.bf16.mxu0 %v399_v1  ;;  %376 = vmatprep.subr.bf16.mxu1 %v399_v1  ;;  %v407_v5 = vld [vmem:[#allocation2 + $0x20] sm:$0xff]   ;;  %v408_v10 = vld [vmem:[#allocation2 + $0x8] sm:$0xff]   ;;  %v410_v12 = vld [vmem:[#allocation2 + $0x10] sm:$0xff]  }
  0x20   :  { %359 = vmatprep.mubr.bf16.mxu0 %v406_v4  ;;  %367 = vmatprep.mubr.bf16.mxu1 %v407_v5  ;;  %v405_v9 = vld [vmem:[#allocation5] sm:$0xff]   ;;  %v409_v11 = vld [vmem:[#allocation2 + $0x28] sm:$0xff]   ;;  %v411_v13 = vld [vmem:[#allocation2 + $0x30] sm:$0xff]  }
  0x21   :  { %v412_v14 = vld [vmem:[#allocation2 + $0x18] sm:$0xff]   ;;  %v310_v16 = vld [vmem:[%s521_s2] ss:$0 sm:$0xff]  ;;  %s484_s2 = smov [#allocation7]  }
  0x22   :  { %346 = vmatpush3.bf16.msra.mxu0 %v399_v1  ;;  %384 = vmatpush3.bf16.msra.mxu1 %v399_v1  ;;  %v413_v15 = vld [vmem:[#allocation2 + $0x38] sm:$0xff]   ;;  %s297_s24 = sshll.u32 %s484_s2, 4  ;;  %s298_s24 = int_to_ptr.vmem [resolvable:$true] %s297_s24 }
  0x23   :  { %347 = vmatprep.subr.bf16.mxu0 %v400_v2  ;;  %377 = vmatprep.subr.bf16.mxu1 %v400_v2  ;;  %s454_s25 = scalar_lea.vmem %s298_s24, 2048  ;;  %p459_p11 = scmp.lt.s32.totalorder %s298_s24, %s298_s24 }
  0x24   :  { %p455_p10 = scmp.ne.s32.totalorder %s298_s24, %s454_s25  ;;  %p460_p12 = scmp.lt.s32.totalorder %s454_s25, %s454_s25 }
  0x26   :  { %348 = vmatpush3.bf16.msra.mxu0 %v400_v2  ;;  %385 = vmatpush3.bf16.msra.mxu1 %v400_v2  ;;  %p461_p13 = por %p460_p12, %p459_p11 }
  0x27   :  { %349 = vmatprep.subr.bf16.mxu0 %v401_v3  ;;  %378 = vmatprep.subr.bf16.mxu1 %v401_v3 }
  0x28   :  { %p462_p0 = pnand %p461_p13, %p455_p10 }
  0x2a   :  { %350 = vmatpush3.bf16.msra.mxu0 %v401_v3  ;;  %386 = vmatpush3.bf16.msra.mxu1 %v401_v3 }
  0x2b   :  { %351 = vmatprep.subr.bf16.mxu0 %v402_v6  ;;  %379 = vmatprep.subr.bf16.mxu1 %v402_v6 }
  0x2e   :  { %352 = vmatpush3.bf16.msra.mxu0 %v402_v6  ;;  %387 = vmatpush3.bf16.msra.mxu1 %v402_v6 }
  0x2f   :  { %353 = vmatprep.subr.bf16.mxu0 %v403_v7  ;;  %380 = vmatprep.subr.bf16.mxu1 %v403_v7 }
  0x32   :  { %354 = vmatpush3.bf16.msra.mxu0 %v403_v7  ;;  %388 = vmatpush3.bf16.msra.mxu1 %v403_v7 }
  0x33   :  { %355 = vmatprep.subr.bf16.mxu0 %v404_v8  ;;  %381 = vmatprep.subr.bf16.mxu1 %v404_v8 }
  0x36   :  { %356 = vmatpush3.bf16.msra.mxu0 %v404_v8  ;;  %389 = vmatpush3.bf16.msra.mxu1 %v404_v8 }
  0x37   :  { %357 = vmatprep.subr.bf16.mxu0 %v405_v9  ;;  %382 = vmatprep.subr.bf16.mxu1 %v405_v9 }
  0x3a   :  { %358 = vmatpush3.bf16.msra.mxu0 %v405_v9  ;;  %390 = vmatpush3.bf16.msra.mxu1 %v405_v9 }
  0x3d   :  { %360 = vmatmul.mubr.bf16.vlgmr.msra.gmra.mxu0 %v408_v10  ;;  %368 = vmatmul.mubr.bf16.vlgmr.msra.gmra.mxu1 %v409_v11 }
  0x3e   :  { %363 = vmatprep.mubr.bf16.mxu0 %v410_v12  ;;  %371 = vmatprep.mubr.bf16.mxu1 %v411_v13 }
  0x45   :  { %364 = vmatmul.mubr.bf16.gmra.mxu0 %v412_v14  ;;  %372 = vmatmul.mubr.bf16.gmra.mxu1 %v413_v15 }
  0xfd   :  { %v361_v17 = vpop.f32.mrf.mxu0  ;;  %v369_v18 = vpop.f32.mrf.mxu1 }
  0xfe   :  { %v222_v19 = vadd.f32 %v361_v17, %v310_v16  ;;  %v254_v20 = vadd.f32 %v369_v18, %v310_v16 }
  0xff   :  { %v213_v21 = vpop.f32.mrf.mxu0  ;;  %v245_v22 = vpop.f32.mrf.mxu1 }
 0x100   :  { %278 = vst [vmem:[#allocation7 + $0x10] sm:$0xff] %v222_v19  ;;  %286 = vst [vmem:[#allocation7 + $0x50] sm:$0xff] %v254_v20  ;;  %v214_v23 = vadd.f32 %v310_v16, %v213_v21  ;;  %v246_v24 = vadd.f32 %v310_v16, %v245_v22 }
 0x101   :  { %v362_v25 = vpop.f32.mrf.mxu0  ;;  %v370_v26 = vpop.f32.mrf.mxu1 }
 0x102   :  { %276 = vst [vmem:[#allocation7] sm:$0xff] %v214_v23  ;;  %284 = vst [vmem:[#allocation7 + $0x40] sm:$0xff] %v246_v24  ;;  %v225_v27 = vadd.f32 %v362_v25, %v310_v16  ;;  %v257_v28 = vadd.f32 %v370_v26, %v310_v16 }
 0x103   :  { %v216_v29 = vpop.f32.mrf.mxu0  ;;  %v248_v30 = vpop.f32.mrf.mxu1 }
 0x104   :  { %279 = vst [vmem:[#allocation7 + $0x18] sm:$0xff] %v225_v27  ;;  %287 = vst [vmem:[#allocation7 + $0x58] sm:$0xff] %v257_v28  ;;  %v217_v31 = vadd.f32 %v310_v16, %v216_v29  ;;  %v249_v32 = vadd.f32 %v310_v16, %v248_v30 }
 0x105   :  { %v365_v33 = vpop.f32.mrf.mxu0  ;;  %v373_v34 = vpop.f32.mrf.mxu1 }
 0x106   :  { %277 = vst [vmem:[#allocation7 + $0x8] sm:$0xff] %v217_v31  ;;  %285 = vst [vmem:[#allocation7 + $0x48] sm:$0xff] %v249_v32  ;;  %v238_v35 = vadd.f32 %v365_v33, %v310_v16  ;;  %v270_v36 = vadd.f32 %v373_v34, %v310_v16 }
 0x107   :  { %v229_v37 = vpop.f32.mrf.mxu0  ;;  %v261_v38 = vpop.f32.mrf.mxu1 }
 0x108   :  { %282 = vst [vmem:[#allocation7 + $0x30] sm:$0xff] %v238_v35  ;;  %290 = vst [vmem:[#allocation7 + $0x70] sm:$0xff] %v270_v36  ;;  %v230_v39 = vadd.f32 %v310_v16, %v229_v37  ;;  %v262_v40 = vadd.f32 %v310_v16, %v261_v38 }
 0x109   :  { %v366_v41 = vpop.f32.mrf.mxu0  ;;  %v374_v42 = vpop.f32.mrf.mxu1 }
 0x10a   :  { %280 = vst [vmem:[#allocation7 + $0x20] sm:$0xff] %v230_v39  ;;  %288 = vst [vmem:[#allocation7 + $0x60] sm:$0xff] %v262_v40  ;;  %v241_v43 = vadd.f32 %v366_v41, %v310_v16  ;;  %v273_v44 = vadd.f32 %v374_v42, %v310_v16 }
 0x10b   :  { %v232_v45 = vpop.f32.mrf.mxu0  ;;  %v264_v46 = vpop.f32.mrf.mxu1 }
 0x10c   :  { %283 = vst [vmem:[#allocation7 + $0x38] sm:$0xff] %v241_v43  ;;  %291 = vst [vmem:[#allocation7 + $0x78] sm:$0xff] %v273_v44  ;;  %v233_v47 = vadd.f32 %v310_v16, %v232_v45  ;;  %v265_v48 = vadd.f32 %v310_v16, %v264_v46 }
 0x10e   :  { %281 = vst [vmem:[#allocation7 + $0x28] sm:$0xff] %v233_v47  ;;  %289 = vst [vmem:[#allocation7 + $0x68] sm:$0xff] %v265_v48 }
 0x10f   :  { %465 = shalt.err (!%p462_p0)
}
 0x110   :  { %s485_s26 = smov 128   ;;  %s486_s27 = smov 8  }
 0x111   :  { %303 = dma.vmem_to_hbm [thread:$0]  %s298_s24, 2048, %s522_s3, [#allocation4], %s485_s26, %s485_s26, %s486_s27  }
 0x112   :  { %478 = dma.done.wait [#allocation4], 2048  }
 0x113   :  { %479 = vsyncadd [#allocation4], 4294965248 }
 0x114   :  { %307 = vsyncpa [#allocation3], 1 }
 0x115   :  { %308 = vsyncpa [#allocation6], 1 }
 0x116   :  { %309 = vsyncpa [#allocation4], 1 }

</bundles_post_ra>
